<compile_context>
chip_gen: v7x
topology: tpu7x:2x2x1
jax: 0.10.0
libtpu: 0.0.40
codegen_flags: <defaults>
</compile_context>

<pallas_src>
import functools

import jax
import jax.numpy as jnp
from jax.experimental import pallas as pl
from jax.experimental.pallas import tpu as pltpu

_LANE = 128


def _round_up(n, m):
    return ((n + m - 1) // m) * m


def _cdiv(a, b):
    return (a + b - 1) // b


def _vmem_limits():
    """Generation-aware (scoped-VMEM limit, path-selection budget) in bytes."""
    phys = None
    try:
        info = pltpu.get_tpu_info()
        phys = getattr(info, "vmem_capacity_bytes", None)
    except Exception:
        phys = None
    if not phys or phys <= 0:
        phys = 64 << 20                       # conservative: v7x-class per-TC VMEM
    limit = int(min(phys * 3 // 4, 100 << 20))  # explicit scoped-VMEM limit
    budget = int(limit * 0.6)                 # ~40% headroom for Mosaic temps
    return limit, budget


def _excite(y, w1, w2):
    """(B, C) pooled means -> (B, C) sigmoid gate, on the VPU (no MXU).

    The two FCs are (B,C)x(C,Cr) and (B,Cr)x(Cr,C) with Cr == C//16 (== 2 for
    channel=32): an MXU matmul would pad to a full 128/256 tile for ~64 useful
    MACs, so broadcast-multiply + sublane reduce on the VPU/XLU is cheaper.
    """
    h = jnp.maximum(jnp.sum(y[:, :, None] * w1[None, :, :], axis=1), 0.0)
    return jax.nn.sigmoid(jnp.sum(h[:, :, None] * w2[None, :, :], axis=1))


# --------------------------------------------------------------------------
# Path "fused": grid-less, whole problem resident in VMEM (tiny inputs only).
# --------------------------------------------------------------------------
def _se_fused_kernel(x_ref, w1_ref, w2_ref, o_ref, *, inv_hw):
    x = x_ref[...]                                         # (B, C, HW)
    xf = x.astype(jnp.float32)                             # f32 accumulation
    y = jnp.sum(xf, axis=-1) * inv_hw                      # (B, C)
    g = _excite(y, w1_ref[...], w2_ref[...])               # (B, C)
    o_ref[...] = (xf * g[:, :, None]).astype(o_ref.dtype)


# --------------------------------------------------------------------------
# Path "batched": single pass, one batch's full (C, HW) block per grid step,
# double-buffered by the BlockSpec pipeline.
# --------------------------------------------------------------------------
def _se_batched_kernel(x_ref, w1_ref, w2_ref, o_ref, *, inv_hw):
    x = x_ref[...]                                         # (1, C, HW)
    xf = x.astype(jnp.float32)
    y = jnp.sum(xf, axis=-1) * inv_hw                      # (1, C)
    g = _excite(y, w1_ref[...], w2_ref[...])               # (1, C)
    o_ref[...] = (xf * g[:, :, None]).astype(o_ref.dtype)


# --------------------------------------------------------------------------
# Path "tiled", pass 1: pool + gate with a resident (1, 1, C) accumulator.
# --------------------------------------------------------------------------
def _se_pool_gate_kernel(x_ref, w1_ref, w2_ref, g_ref, *, inv_hw, hw_total, t_hw):
    hw = pl.program_id(1)

    @pl.when(hw == 0)
    def _():
        g_ref[...] = jnp.zeros_like(g_ref)

    x = x_ref[...].astype(jnp.float32)                     # (1, C, t_hw)
    # Mask the ragged last tile (its OOB lanes read unspecified data) instead
    # of padding x in the wrapper — a couple of VPU ops, free under the DMA.
    lane = jax.lax.broadcasted_iota(jnp.int32, x.shape, 2)
    x = jnp.where(lane < (hw_total - hw * t_hw), x, 0.0)
    g_ref[...] += jnp.sum(x, axis=-1)[:, None, :]          # (1, 1, C)

    @pl.when(hw == pl.num_programs(1) - 1)
    def _():
        y = g_ref[...][:, 0, :] * inv_hw                   # (1, C)
        g_ref[...] = _excite(y, w1_ref[...], w2_ref[...])[:, None, :]


# --------------------------------------------------------------------------
# Path "tiled", pass 2: re-stream x and apply the per-channel gate.
# --------------------------------------------------------------------------
def _se_scale_kernel(x_ref, g_ref, o_ref):
    gate = g_ref[...][:, 0, :, None]                       # (1, C, 1)
    o_ref[...] = (x_ref[...] * gate).astype(o_ref.dtype)


# --------------------------------------------------------------------------
# Wrapper
# --------------------------------------------------------------------------
def se_layer(x, w1, w2, *, force_path=None):
    """SELayer forward.  x: (B, C, H, W); w1: (C, C//r); w2: (C//r, C)."""
    B, C, H, W = x.shape
    HW = H * W
    Cr = w1.shape[1]
    itemsize = jnp.dtype(x.dtype).itemsize
    limit, budget = _vmem_limits()

    x_flat = x.reshape(B, C, HW)
    inv_hw = 1.0 / float(HW)
    w_bytes = (C * Cr + Cr * C) * 4

    # Path selection (memory-bound op: minimize HBM traffic, keep pipelining).
    tiny_bytes = 2 * B * C * HW * itemsize + w_bytes       # x + out, no dbl-buf
    batch_bytes = 4 * C * HW * itemsize + w_bytes          # 2x in + 2x out bufs
    path = force_path
    if path is None:
        if tiny_bytes <= (2 << 20):
            path = "fused"
        elif int(batch_bytes * 1.3) <= budget:
            path = "batched"
        else:
            path = "tiled"

    if path == "fused":
        out_flat = pl.pallas_call(
            functools.partial(_se_fused_kernel, inv_hw=inv_hw),
            out_shape=jax.ShapeDtypeStruct((B, C, HW), x.dtype),
            compiler_params=pltpu.CompilerParams(vmem_limit_bytes=limit),
        )(x_flat, w1, w2)

    elif path == "batched":
        # TODO(synk): on v7x with B == 1, split HW in half across the two
        # TensorCores (per-core partial pools combined in a tiny second step).
        out_flat = pl.pallas_call(
            functools.partial(_se_batched_kernel, inv_hw=inv_hw),
            out_shape=jax.ShapeDtypeStruct((B, C, HW), x.dtype),
            grid_spec=pltpu.PrefetchScalarGridSpec(
                num_scalar_prefetch=0,
                grid=(B,),
                in_specs=[
                    pl.BlockSpec((1, C, HW), lambda b: (b, 0, 0)),
                    pl.BlockSpec((C, Cr), lambda b: (0, 0)),
                    pl.BlockSpec((Cr, C), lambda b: (0, 0)),
                ],
                out_specs=pl.BlockSpec((1, C, HW), lambda b: (b, 0, 0)),
            ),
            compiler_params=pltpu.CompilerParams(
                dimension_semantics=("parallel",), vmem_limit_bytes=limit),
        )(x_flat, w1, w2)

    else:  # "tiled": two-pass fallback for shapes whose batch exceeds VMEM.
        # Largest lane-dense HW tile such that 2x-in + 2x-out double buffers
        # stay inside the budget; cap at 32768 lanes (4 MiB at C=32 / f32).
        max_t = max(_LANE, (budget // (4 * C * itemsize)) // _LANE * _LANE)
        t_hw = max(_LANE, min(max_t, 32768, _round_up(HW, _LANE)))
        n_hw = _cdiv(HW, t_hw)

        # Pass 1: pooled sum accumulated in the resident (1, 1, C) output block
        # (pl.when init / finalize); ragged last tile masked in-kernel.
        gates = pl.pallas_call(
            functools.partial(_se_pool_gate_kernel, inv_hw=inv_hw,
                              hw_total=HW, t_hw=t_hw),
            out_shape=jax.ShapeDtypeStruct((B, 1, C), jnp.float32),
            grid_spec=pltpu.PrefetchScalarGridSpec(
                num_scalar_prefetch=0,
                grid=(B, n_hw),
                in_specs=[
                    pl.BlockSpec((1, C, t_hw), lambda b, h: (b, 0, h)),
                    pl.BlockSpec((C, Cr), lambda b, h: (0, 0)),
                    pl.BlockSpec((Cr, C), lambda b, h: (0, 0)),
                ],
                out_specs=pl.BlockSpec((1, 1, C), lambda b, h: (b, 0, 0)),
            ),
            compiler_params=pltpu.CompilerParams(
                dimension_semantics=("parallel", "arbitrary"),
                vmem_limit_bytes=limit),
        )(x_flat, w1, w2)

        # Pass 2: re-stream x and apply the gate; OOB lanes of the last tile's
        # output block are discarded by Pallas (no wrapper padding needed).
        out_flat = pl.pallas_call(
            _se_scale_kernel,
            out_shape=jax.ShapeDtypeStruct((B, C, HW), x.dtype),
            grid_spec=pltpu.PrefetchScalarGridSpec(
                num_scalar_prefetch=0,
                grid=(B, n_hw),
                in_specs=[
                    pl.BlockSpec((1, C, t_hw), lambda b, h: (b, 0, h)),
                    pl.BlockSpec((1, 1, C), lambda b, h: (b, 0, 0)),
                ],
                out_specs=pl.BlockSpec((1, C, t_hw), lambda b, h: (b, 0, h)),
            ),
            compiler_params=pltpu.CompilerParams(
                dimension_semantics=("parallel", "parallel"),
                vmem_limit_bytes=limit),
        )(x_flat, gates)

    return out_flat.reshape(B, C, H, W)


def se_layer_ref(x, w1, w2):
    """Pure-JAX reference matching the PyTorch SELayer.forward (f32 math)."""
    xf = x.astype(jnp.float32)
    y = jnp.mean(xf, axis=(2, 3))                          # (B, C)
    h = jnp.maximum(y @ w1, 0.0)                           # (B, C//r)
    s = jax.nn.sigmoid(h @ w2)                             # (B, C)
    return xf * s[:, :, None, None]


if __name__ == "__main__":
    # Module config: channel=32, reduction=16 -> hidden = 2
    B, C, H, W = 2, 32, 16, 16
    reduction = 16
    Cr = C // reduction

    key = jax.random.PRNGKey(0)
    kx, k1, k2, kx2 = jax.random.split(key, 4)

    x = jax.random.normal(kx, (B, C, H, W), dtype=jnp.float32)
    # PyTorch Linear stores (out, in); we pass the transposed (in, out) layout.
    w1 = jax.random.normal(k1, (C, Cr), dtype=jnp.float32) * (1.0 / jnp.sqrt(C))
    w2 = jax.random.normal(k2, (Cr, C), dtype=jnp.float32) * (1.0 / jnp.sqrt(Cr))

    ref = se_layer_ref(x, w1, w2)

    # Auto path (tiny shape -> grid-less fused).
    out = jax.block_until_ready(se_layer(x, w1, w2))
    assert out.shape == (B, C, H, W)
    assert jnp.allclose(out, ref, atol=1e-5, rtol=1e-5), "fused path mismatch"

    # Forced pipelined per-batch single-pass path.
    out_b = jax.block_until_ready(se_layer(x, w1, w2, force_path="batched"))
    assert jnp.allclose(out_b, ref, atol=1e-5, rtol=1e-5), "batched path mismatch"

    # Forced two-pass tiled fallback.
    out_t = jax.block_until_ready(se_layer(x, w1, w2, force_path="tiled"))
    assert jnp.allclose(out_t, ref, atol=1e-5, rtol=1e-5), "tiled path mismatch"

    # Ragged spatial size (HW = 100): exercises in-kernel lane masking and the
    # no-wrapper-padding paths on all three variants.
    x_odd = jax.random.normal(kx2, (B, C, 10, 10), dtype=jnp.float32)
    ref_odd = se_layer_ref(x_odd, w1, w2)
    for p in (None, "batched", "tiled"):
        o = jax.block_until_ready(se_layer(x_odd, w1, w2, force_path=p))
        assert jnp.allclose(o, ref_odd, atol=1e-5, rtol=1e-5), f"ragged {p} mismatch"

    # bf16 I/O with f32 accumulation inside the kernels.
    x_bf = x.astype(jnp.bfloat16)
    ref_bf = se_layer_ref(x_bf.astype(jnp.float32), w1, w2)
    for p in (None, "batched", "tiled"):
        o = jax.block_until_ready(se_layer(x_bf, w1, w2, force_path=p))
        assert o.dtype == jnp.bfloat16
        assert jnp.allclose(o.astype(jnp.float32), ref_bf, atol=3e-2, rtol=3e-2), \
            f"bf16 {p} mismatch"

    print("KERNEL_OK")
</pallas_src>

<mosaic_0001>
module attributes {stable_mosaic.version = 11 : i64} {
  func.func @_se_fused_kernel(%arg0: memref<2x32x256xf32, #tpu.memory_space<vmem>>, %arg1: memref<32x2xf32, #tpu.memory_space<vmem>>, %arg2: memref<2x32xf32, #tpu.memory_space<vmem>>, %arg3: memref<2x32x256xf32, #tpu.memory_space<vmem>>) attributes {dimension_semantics = [], scalar_prefetch = 0 : i64, scratch_operands = 0 : i64, tpu.core_type = #tpu.core_type<tc>} {
    %c0 = arith.constant 0 : index
    %c0_0 = arith.constant 0 : index
    %c0_1 = arith.constant 0 : index
    %0 = vector.load %arg0[%c0, %c0_0, %c0_1] : memref<2x32x256xf32, #tpu.memory_space<vmem>>, vector<2x32x256xf32>
    %cst = arith.constant dense<0.000000e+00> : vector<2x32xf32>
    %1 = vector.multi_reduction <add>, %0, %cst [2] : vector<2x32x256xf32> to vector<2x32xf32>
    %cst_2 = arith.constant 3.906250e-03 : f32
    %2 = vector.broadcast %cst_2 : f32 to vector<2x32xf32>
    %3 = arith.mulf %1, %2 : vector<2x32xf32>
    %c0_3 = arith.constant 0 : index
    %c0_4 = arith.constant 0 : index
    %4 = vector.load %arg1[%c0_3, %c0_4] : memref<32x2xf32, #tpu.memory_space<vmem>>, vector<32x2xf32>
    %c0_5 = arith.constant 0 : index
    %c0_6 = arith.constant 0 : index
    %5 = vector.load %arg2[%c0_5, %c0_6] : memref<2x32xf32, #tpu.memory_space<vmem>>, vector<2x32xf32>
    %6 = vector.shape_cast %3 : vector<2x32xf32> to vector<2x32x1xf32>
    %7 = vector.shape_cast %4 : vector<32x2xf32> to vector<1x32x2xf32>
    %8 = vector.broadcast %6 : vector<2x32x1xf32> to vector<2x32x2xf32>
    %9 = vector.broadcast %7 : vector<1x32x2xf32> to vector<2x32x2xf32>
    %10 = arith.mulf %8, %9 : vector<2x32x2xf32>
    %cst_7 = arith.constant dense<0.000000e+00> : vector<2x2xf32>
    %11 = vector.multi_reduction <add>, %10, %cst_7 [1] : vector<2x32x2xf32> to vector<2x2xf32>
    %cst_8 = arith.constant 0.000000e+00 : f32
    %12 = vector.broadcast %cst_8 : f32 to vector<2x2xf32>
    %13 = arith.maximumf %11, %12 : vector<2x2xf32>
    %14 = vector.shape_cast %13 : vector<2x2xf32> to vector<2x2x1xf32>
    %15 = vector.shape_cast %5 : vector<2x32xf32> to vector<1x2x32xf32>
    %16 = vector.broadcast %14 : vector<2x2x1xf32> to vector<2x2x32xf32>
    %17 = vector.broadcast %15 : vector<1x2x32xf32> to vector<2x2x32xf32>
    %18 = arith.mulf %16, %17 : vector<2x2x32xf32>
    %cst_9 = arith.constant dense<0.000000e+00> : vector<2x32xf32>
    %19 = vector.multi_reduction <add>, %18, %cst_9 [1] : vector<2x2x32xf32> to vector<2x32xf32>
    %20 = arith.negf %19 : vector<2x32xf32>
    %21 = math.exp %20 : vector<2x32xf32>
    %cst_10 = arith.constant 1.000000e+00 : f32
    %22 = vector.broadcast %cst_10 : f32 to vector<2x32xf32>
    %23 = arith.addf %22, %21 : vector<2x32xf32>
    %24 = arith.divf %22, %23 : vector<2x32xf32>
    %25 = vector.shape_cast %24 : vector<2x32xf32> to vector<2x32x1xf32>
    %26 = vector.broadcast %25 : vector<2x32x1xf32> to vector<2x32x256xf32>
    %27 = arith.mulf %0, %26 : vector<2x32x256xf32>
    %c0_11 = arith.constant 0 : index
    %c0_12 = arith.constant 0 : index
    %c0_13 = arith.constant 0 : index
    %28 = vector.load %arg3[%c0_11, %c0_12, %c0_13] : memref<2x32x256xf32, #tpu.memory_space<vmem>>, vector<2x32x256xf32>
    tpu.vector_store %arg3[%c0_11, %c0_12, %c0_13], %27 {strides = array<i32>} : memref<2x32x256xf32, #tpu.memory_space<vmem>>, vector<2x32x256xf32>,
    return
  }
}

</mosaic_0001>

<bundles_post_ra>
// kernel: tpu_custom_call.1
= control target key start
LH: loop header
LB: loop body
LE: loop exit
PB: predicated region body
PF: predicated region fallthrough
CT: control target
= control target key end

     0   :  { %8 = vsyncpa [#allocation3], 0  ;;  %s436_s0 = inlined_call_operand.hbm [shape: f32[2,32,256], index: 0, kind: input, shape index: {}]   ;;  %s437_s1 = inlined_call_operand.vmem [shape: f32[32,2], index: 1, kind: input, shape index: {}]   ;;  %s438_s2 = inlined_call_operand.vmem [shape: f32[2,32], index: 2, kind: input, shape index: {}]   ;;  %s439_s3 = inlined_call_operand.hbm [shape: f32[2,32,256], index: 3, kind: output, shape index: {}]  }
   0x1   :  { %9 = vsyncpa [#allocation4], 0  ;;  %s295_s12 = smov [#allocation2]   ;;  %s247_s16 = scalar_lea.hbm %s436_s0, 2048 }
   0x2   :  { %s15_s13 = sshll.u32 %s295_s12, 4  ;;  %p248_p0 = scmp.ne.s32.totalorder %s436_s0, %s247_s16  ;;  %s16_s13 = int_to_ptr.vmem [resolvable:$true] %s15_s13 }
   0x3   :  { %p251_p1 = scmp.lt.u32.totalorder %s247_s16, %s436_s0 }
   0x5   :  { %p253_p2 = pnand %p251_p1, %p248_p0 }
   0x7   :  { %256 = shalt.err (!%p253_p2)
}
   0x8   :  { %s257_s21 = scalar_lea.vmem %s16_s13, 2048  ;;  %p262_p4 = scmp.lt.s32.totalorder %s16_s13, %s16_s13 }
   0x9   :  { %p258_p3 = scmp.ne.s32.totalorder %s16_s13, %s257_s21  ;;  %p263_p5 = scmp.lt.s32.totalorder %s257_s21, %s257_s21 }
   0xb   :  { %p264_p6 = por %p263_p5, %p262_p4 }
   0xd   :  { %p265_p7 = pnand %p264_p6, %p258_p3 }
   0xf   :  { %268 = shalt.err (!%p265_p7)
}
  0x10   :  { %s296_s22 = smov 256   ;;  %s297_s23 = smov 16  }
  0x11   :  { %21 = dma.hbm_to_vmem [thread:$0]  %s436_s0, 2048, %s16_s13, [#allocation3], %s296_s22, %s296_s22, %s297_s23  }
  0x12   :  { %291 = dma.done.wait [#allocation3], 2048  }
  0x13   :  { %292 = vsyncadd [#allocation3], 4294965248  ;;  %v334_v0 = vld [vmem:[#allocation2 + $0x40] sm:$0xff]  ;;  %v336_v1 = vld [vmem:[#allocation2 + $0x48] sm:$0xff]  ;;  %vm90_vm0 = vcmask 15360   ;;  %vm127_vm1 = vcmask 254976  }
  0x14   :  { %v338_v2 = vld [vmem:[#allocation2] sm:$0xff]  ;;  %v57_v3 = vadd.f32 %v336_v1, %v334_v0  ;;  %v342_v4 = vld [vmem:[#allocation2 + $0x8] sm:$0xff]  ;;  %v344_v5 = vld [vmem:[#allocation2 + $0x50] sm:$0xff] }
  0x15   :  { %v346_v6 = vld [vmem:[#allocation2 + $0x58] sm:$0xff]  ;;  %v45_v7 = vadd.f32 %v342_v4, %v338_v2  ;;  %v350_v8 = vld [vmem:[#allocation2 + $0x10] sm:$0xff]  ;;  %v358_v12 = vld [vmem:[#allocation2 + $0x60] sm:$0xff] }
  0x16   :  { %v352_v9 = vld [vmem:[#allocation2 + $0x18] sm:$0xff]  ;;  %58 = vadd.xlane.f32.xlu1 %v57_v3  ;;  %v60_v10 = vadd.f32 %v346_v6, %v344_v5  ;;  %v360_v13 = vld [vmem:[#allocation2 + $0x68] sm:$0xff]  ;;  %v362_v14 = vld [vmem:[#allocation2 + $0x20] sm:$0xff] }
  0x17   :  { %46 = vadd.xlane.f32.xlu0 %v45_v7  ;;  %v48_v11 = vadd.f32 %v352_v9, %v350_v8  ;;  %v364_v15 = vld [vmem:[#allocation2 + $0x28] sm:$0xff]  ;;  %v63_v16 = vadd.f32 %v360_v13, %v358_v12  ;;  %v370_v18 = vld [vmem:[#allocation2 + $0x70] sm:$0xff]  ;;  %v372_v19 = vld [vmem:[#allocation2 + $0x78] sm:$0xff] }
  0x18   :  { %v51_v17 = vadd.f32 %v364_v15, %v362_v14  ;;  %v374_v20 = vld [vmem:[#allocation2 + $0x30] sm:$0xff]  ;;  %v376_v21 = vld [vmem:[#allocation2 + $0x38] sm:$0xff]  ;;  %v66_v22 = vadd.f32 %v372_v19, %v370_v18  ;;  %v77_v27 = vld [vmem:[%s437_s1] sm:$0xff] }
  0x19   :  { %v54_v23 = vadd.f32 %v376_v21, %v374_v20  ;;  %v78_v30 = vld [vmem:[%s437_s1 + $0x8] sm:$0xff]  ;;  %v79_v40 = vld [vmem:[%s437_s1 + $0x10] sm:$0xff]  ;;  %v80_v49 = vld [vmem:[%s437_s1 + $0x18] sm:$0xff] }
  0x1a   :  { %61 = vadd.xlane.f32.xlu1 %v60_v10 }
  0x1b   :  { %49 = vadd.xlane.f32.xlu0 %v48_v11 }
  0x1e   :  { %64 = vadd.xlane.f32.xlu1 %v63_v16 }
  0x1f   :  { %52 = vadd.xlane.f32.xlu0 %v51_v17 }
  0x22   :  { %67 = vadd.xlane.f32.xlu1 %v66_v22 }
  0x23   :  { %55 = vadd.xlane.f32.xlu0 %v54_v23 }
  0xa3   :  { %v59_v24 = vpop.xlane.xlu1 %58 }
  0xa4   :  { %v73_v25 = vmul.f32 0.00390625, %v59_v24  ;;  %v47_v26 = vpop.xlane.xlu0 %46 }
  0xa5   :  { %v69_v33 = vmul.f32 0.00390625, %v47_v26 }
  0xa6   :  { %v86_v28 = vmul.f32 %v77_v27, %v73_v25 }
  0xa7   :  { %v62_v29 = vpop.xlane.xlu1 %61  ;;  %v82_v43 = vmul.f32 %v77_v27, %v69_v33 }
  0xa8   :  { %v74_v31 = vmul.f32 0.00390625, %v62_v29  ;;  %v50_v32 = vpop.xlane.xlu0 %49  ;;  %v104_v35 = vsel %vm90_vm0, %v86_v28, 0.0 }
  0xa9   :  { %v70_v34 = vmul.f32 0.00390625, %v50_v32  ;;  %v91_v54 = vsel %vm90_vm0, %v82_v43, 0.0  ;;  %v81_v32 = vld [vmem:[%s438_s2] sm:$0x3]  ;;  %s298_s2 = smov [#allocation5]  }
  0xaa   :  { %v87_v36 = vmul.f32 %v78_v30, %v74_v31  ;;  %s221_s7 = sshll.u32 %s298_s2, 4  ;;  %s222_s7 = int_to_ptr.vmem [resolvable:$true] %s221_s7 }
  0xab   :  { %v83_v37 = vmul.f32 %v78_v30, %v70_v34  ;;  %v65_v38 = vpop.xlane.xlu1 %64  ;;  %s269_s8 = scalar_lea.vmem %s222_s7, 2048  ;;  %p274_p9 = scmp.lt.s32.totalorder %s222_s7, %s222_s7 }
  0xac   :  { %v105_v39 = vsel %vm90_vm0, %v87_v36, 0.0  ;;  %v75_v41 = vmul.f32 0.00390625, %v65_v38  ;;  %v53_v42 = vpop.xlane.xlu0 %52  ;;  %p270_p8 = scmp.ne.s32.totalorder %s222_s7, %s269_s8  ;;  %p275_p10 = scmp.lt.s32.totalorder %s269_s8, %s269_s8 }
  0xad   :  { %v106_v44 = vadd.f32 %v105_v39, %v104_v35  ;;  %v71_v45 = vmul.f32 0.00390625, %v53_v42  ;;  %v92_v47 = vsel %vm90_vm0, %v83_v37, 0.0 }
  0xae   :  { %v88_v46 = vmul.f32 %v79_v40, %v75_v41  ;;  %v93_v58 = vadd.f32 %v92_v47, %v91_v54  ;;  %p276_p11 = por %p275_p10, %p274_p9 }
  0xaf   :  { %v84_v48 = vmul.f32 %v79_v40, %v71_v45  ;;  %v68_v50 = vpop.xlane.xlu1 %67 }
  0xb0   :  { %v107_v51 = vsel %vm90_vm0, %v88_v46, 0.0  ;;  %v76_v52 = vmul.f32 0.00390625, %v68_v50  ;;  %v56_v53 = vpop.xlane.xlu0 %55  ;;  %p277_p12 = pnand %p276_p11, %p270_p8 }
  0xb1   :  { %v108_v55 = vadd.f32 %v107_v51, %v106_v44  ;;  %v94_v56 = vsel %vm90_vm0, %v84_v48, 0.0  ;;  %v72_v57 = vmul.f32 0.00390625, %v56_v53 }
  0xb2   :  { %v89_v59 = vmul.f32 %v80_v49, %v76_v52  ;;  %v95_v61 = vadd.f32 %v94_v56, %v93_v58 }
  0xb3   :  { %v85_v60 = vmul.f32 %v80_v49, %v72_v57 }
  0xb4   :  { %v109_v62 = vsel %vm90_vm0, %v89_v59, 0.0 }
  0xb5   :  { %v110_v63 = vadd.f32 %v109_v62, %v108_v55  ;;  %v96_v3 = vsel %vm90_vm0, %v85_v60, 0.0 }
  0xb6   :  { %v97_v7 = vadd.f32 %v96_v3, %v95_v61 }
  0xb7   :  { %v111_v10 = vrot.slane %v110_v63, 4 }
  0xb8   :  { %v98_v11 = vrot.slane %v97_v7, 4 }
  0xb9   :  { %v112_v16 = vadd.f32 %v111_v10, %v110_v63 }
  0xba   :  { %v99_v17 = vadd.f32 %v98_v11, %v97_v7 }
  0xbb   :  { %v113_v22 = vrot.slane %v112_v16, 2 }
  0xbc   :  { %v100_v23 = vrot.slane %v99_v17, 2 }
  0xbd   :  { %v114_v24 = vadd.f32 %v113_v22, %v112_v16 }
  0xbe   :  { %v101_v25 = vadd.f32 %v100_v23, %v99_v17 }
  0xbf   :  { %v115_v26 = vrot.slane %v114_v24, 1 }
  0xc0   :  { %v102_v27 = vrot.slane %v101_v25, 1 }
  0xc1   :  { %v116_v28 = vadd.f32 %v115_v26, %v114_v24 }
  0xc2   :  { %v103_v29 = vadd.f32 %v102_v27, %v101_v25 }
  0xc3   :  { %v118_v30 = vmax.f32 %v116_v28, 0.0 }
  0xc4   :  { %v117_v31 = vmax.f32 %v103_v29, 0.0 }
  0xc5   :  { %123 = vbcast.lane.b32.xlu1 %v118_v30, 256 }
  0xc6   :  { %120 = vbcast.lane.b32.xlu0 %v117_v31, 256 }
 0x137   :  { %v124_v33 = vpop.permute.xlu1 %123 }
 0x138   :  { %v126_v34 = vmul.f32 %v124_v33, %v81_v32  ;;  %v121_v35 = vpop.permute.xlu0 %120 }
 0x139   :  { %v125_v36 = vmul.f32 %v121_v35, %v81_v32 }
 0x13a   :  { %v135_v37 = vsel %vm127_vm1, %v126_v34, 0.0 }
 0x13b   :  { %v136_v38 = vrot.slane %v135_v37, 4  ;;  %v128_v39 = vsel %vm127_vm1, %v125_v36, 0.0 }
 0x13c   :  { %v129_v40 = vrot.slane %v128_v39, 4 }
 0x13d   :  { %v137_v41 = vadd.f32 %v136_v38, %v135_v37 }
 0x13e   :  { %v130_v42 = vadd.f32 %v129_v40, %v128_v39 }
 0x13f   :  { %v138_v43 = vrot.slane %v137_v41, 2 }
 0x140   :  { %v131_v44 = vrot.slane %v130_v42, 2 }
 0x141   :  { %v139_v45 = vadd.f32 %v138_v43, %v137_v41 }
 0x142   :  { %v132_v46 = vadd.f32 %v131_v44, %v130_v42 }
 0x143   :  { %v140_v47 = vrot.slane %v139_v45, 1 }
 0x144   :  { %v133_v48 = vrot.slane %v132_v46, 1 }
 0x145   :  { %v141_v49 = vadd.f32 %v140_v47, %v139_v45 }
 0x146   :  { %v134_v50 = vadd.f32 %v133_v48, %v132_v46 }
 0x147   :  { %v234_v51 = vmul.f32 -1.442695, %v141_v49 }
 0x148   :  { %v233_v52 = vmul.f32 -1.442695, %v134_v50 }
 0x149   :  { %239 = vpow2.f32 %v234_v51 }
 0x14a   :  { %241 = vpow2.f32 %v233_v52 }
 0x153   :  { %v240_v53 = vpop.eup %239 }
 0x154   :  { %v242_v54 = vpop.eup %241  ;;  %v149_v56 = vadd.f32 1.0, %v240_v53 }
 0x155   :  { %v148_v55 = vadd.f32 1.0, %v242_v54 }
 0x157   :  { %243 = vrcp.f32 %v148_v55 }
 0x158   :  { %245 = vrcp.f32 %v149_v56 }
 0x161   :  { %v244_v57 = vpop.eup %243 }
 0x162   :  { %163 = vbcast.lane.b32.xlu0 %v244_v57, 272  ;;  %155 = vbcast.lane.b32.xlu1 %v244_v57, 256  ;;  %v246_v58 = vpop.eup %245 }
 0x166   :  { %170 = vbcast.lane.b32.xlu0 %v246_v58, 256  ;;  %159 = vbcast.lane.b32.xlu1 %v244_v57, 264 }
 0x16a   :  { %178 = vbcast.lane.b32.xlu0 %v246_v58, 272  ;;  %167 = vbcast.lane.b32.xlu1 %v244_v57, 280 }
 0x16e   :  { %174 = vbcast.lane.b32.xlu1 %v246_v58, 264 }
 0x172   :  { %182 = vbcast.lane.b32.xlu1 %v246_v58, 280 }
 0x1d4   :  { %v164_v59 = vpop.permute.xlu0 %163  ;;  %v156_v60 = vpop.permute.xlu1 %155 }
 0x1d5   :  { %v188_v61 = vmul.f32 %v164_v59, %v362_v14  ;;  %v189_v62 = vmul.f32 %v164_v59, %v364_v15  ;;  %v184_v63 = vmul.f32 %v156_v60, %v338_v2  ;;  %v185_v3 = vmul.f32 %v156_v60, %v342_v4 }
 0x1d7   :  { %204 = vst [vmem:[#allocation5 + $0x20] sm:$0xff] %v188_v61  ;;  %205 = vst [vmem:[#allocation5 + $0x28] sm:$0xff] %v189_v62 }
 0x1d8   :  { %200 = vst [vmem:[#allocation5] sm:$0xff] %v184_v63  ;;  %201 = vst [vmem:[#allocation5 + $0x8] sm:$0xff] %v185_v3  ;;  %v171_v7 = vpop.permute.xlu0 %170  ;;  %v160_v10 = vpop.permute.xlu1 %159 }
 0x1d9   :  { %v192_v11 = vmul.f32 %v171_v7, %v334_v0  ;;  %v193_v16 = vmul.f32 %v171_v7, %v336_v1  ;;  %v186_v17 = vmul.f32 %v160_v10, %v350_v8  ;;  %v187_v14 = vmul.f32 %v160_v10, %v352_v9 }
 0x1db   :  { %208 = vst [vmem:[#allocation5 + $0x40] sm:$0xff] %v192_v11  ;;  %209 = vst [vmem:[#allocation5 + $0x48] sm:$0xff] %v193_v16 }
 0x1dc   :  { %202 = vst [vmem:[#allocation5 + $0x10] sm:$0xff] %v186_v17  ;;  %203 = vst [vmem:[#allocation5 + $0x18] sm:$0xff] %v187_v14  ;;  %v179_v2 = vpop.permute.xlu0 %178  ;;  %v168_v4 = vpop.permute.xlu1 %167 }
 0x1dd   :  { %v196_v15 = vmul.f32 %v179_v2, %v358_v12  ;;  %v197_v22 = vmul.f32 %v179_v2, %v360_v13  ;;  %v190_v23 = vmul.f32 %v168_v4, %v374_v20  ;;  %v191_v0 = vmul.f32 %v168_v4, %v376_v21 }
 0x1df   :  { %212 = vst [vmem:[#allocation5 + $0x60] sm:$0xff] %v196_v15  ;;  %213 = vst [vmem:[#allocation5 + $0x68] sm:$0xff] %v197_v22 }
 0x1e0   :  { %206 = vst [vmem:[#allocation5 + $0x30] sm:$0xff] %v190_v23  ;;  %207 = vst [vmem:[#allocation5 + $0x38] sm:$0xff] %v191_v0  ;;  %v175_v1 = vpop.permute.xlu1 %174 }
 0x1e1   :  { %v194_v8 = vmul.f32 %v175_v1, %v344_v5  ;;  %v195_v9 = vmul.f32 %v175_v1, %v346_v6 }
 0x1e3   :  { %210 = vst [vmem:[#allocation5 + $0x50] sm:$0xff] %v194_v8  ;;  %211 = vst [vmem:[#allocation5 + $0x58] sm:$0xff] %v195_v9 }
 0x1e4   :  { %v183_v12 = vpop.permute.xlu1 %182 }
 0x1e5   :  { %v198_v13 = vmul.f32 %v183_v12, %v370_v18  ;;  %v199_v20 = vmul.f32 %v183_v12, %v372_v19 }
 0x1e7   :  { %214 = vst [vmem:[#allocation5 + $0x70] sm:$0xff] %v198_v13  ;;  %215 = vst [vmem:[#allocation5 + $0x78] sm:$0xff] %v199_v20 }
 0x1e8   :  { %280 = shalt.err (!%p277_p12)
}
 0x1e9   :  { %s281_s11 = scalar_lea.hbm %s439_s3, 2048 }
 0x1ea   :  { %p282_p13 = scmp.ne.s32.totalorder %s439_s3, %s281_s11  ;;  %p285_p0 = scmp.lt.u32.totalorder %s281_s11, %s439_s3 }
 0x1ec   :  { %p287_p1 = pnand %p285_p0, %p282_p13 }
 0x1ee   :  { %290 = shalt.err (!%p287_p1)
}
 0x1ef   :  { %227 = dma.vmem_to_hbm [thread:$0]  %s222_s7, 2048, %s439_s3, [#allocation4], %s296_s22, %s296_s22, %s297_s23  }
 0x1f0   :  { %293 = dma.done.wait [#allocation4], 2048  }
 0x1f1   :  { %294 = vsyncadd [#allocation4], 4294965248 }
 0x1f2   :  { %231 = vsyncpa [#allocation3], 1 }
 0x1f3   :  { %232 = vsyncpa [#allocation4], 1 }

</bundles_post_ra>
